<compile_context>
chip_gen: v6e
topology: v6e:2x2x1
jax: 0.10.0
libtpu: 0.0.40
codegen_flags: <defaults>
</compile_context>

<pallas_src>
import functools

import jax
import jax.numpy as jnp
from jax.experimental import pallas as pl
from jax.experimental.pallas import tpu as pltpu

_LANES = 128


def _round_up(a, b):
    return (a + b - 1) // b * b


def _se1_kernel(x_ref, wt_ref, o_ref, acc_ref, *, inv_hw):
    # x_ref  : (tile_n, C, tile_hw)   current HW tile of the input stream
    # wt_ref : (C, c_out)             pre-transposed 1x1 conv weight (resident)
    # o_ref  : (tile_n, c_out)        gate output for this batch tile
    # acc_ref: (tile_n, C, 128) f32   running raw-sum accumulator (VMEM scratch)
    hw = pl.program_id(1)

    @pl.when(hw == 0)
    def _():
        acc_ref[...] = jnp.zeros_like(acc_ref)

    # Accumulate raw sums with VPU adds, one 128-lane chunk per step.
    # The cross-lane (XLU) reduce is deferred to the finalize branch below,
    # so the inner loop stays on vector-ALU slots and hides under the DMA.
    x = x_ref[...]
    n_chunks = x_ref.shape[2] // _LANES
    acc = acc_ref[...]
    for j in range(n_chunks):  # static unroll; tile_hw is capped so this stays small
        chunk = x[:, :, j * _LANES:(j + 1) * _LANES].astype(jnp.float32)
        acc = acc + chunk
    acc_ref[...] = acc

    @pl.when(hw == pl.num_programs(1) - 1)
    def _():
        # Single lane reduce + scale by 1/(H*W)  ==  global average pool.
        pooled = jnp.sum(acc_ref[...], axis=-1) * inv_hw               # (tile_n, C)
        w = wt_ref[...].astype(jnp.float32)                            # (C, c_out)
        logits = jnp.dot(pooled, w, preferred_element_type=jnp.float32)
        y = 1.0 / (1.0 + jnp.exp(-logits))                             # sigmoid
        # Output is tiny; the masked partial store here is negligible by design.
        o_ref[...] = y.astype(o_ref.dtype)


def se1_forward(x, w, *, x_tile_budget_bytes=12 * 1024 * 1024):
    """x: (N, C, H, W); w: (c_out, c_in) 1x1 conv weight (no bias).

    Returns sigmoid(conv1x1(global_avg_pool(x))) with shape (N, c_out, 1, 1).
    """
    N, C, H, W = x.shape
    c_out, c_in = w.shape
    assert c_in == C
    HW = H * W
    x_bytes = jnp.dtype(x.dtype).itemsize

    # ---- batch tiling: full N if small, else a multiple of 8 dividing N ----
    if N <= 8 or N % 8 != 0:
        tile_n = N
    else:
        tile_n = 8
        while tile_n * 2 <= min(N, 64) and N % (tile_n * 2) == 0:
            tile_n *= 2

    # ---- HW tiling: largest multiple of 128 within the per-tile VMEM budget ----
    # Budget keeps 2x (double buffer) x-tile well under v7x's 64 MiB VMEM.
    max_hw = max(_LANES,
                 (x_tile_budget_bytes // max(1, tile_n * C * x_bytes)) // _LANES * _LANES)
    max_hw = min(max_hw, 64 * _LANES)          # cap the static unroll length
    tile_hw = min(max_hw, _round_up(HW, _LANES))
    hw_pad = _round_up(HW, tile_hw)

    x3 = x.reshape(N, C, HW)
    if hw_pad != HW:
        # Zero padding is safe: we accumulate raw sums and divide by the true HW.
        x3 = jnp.pad(x3, ((0, 0), (0, 0), (0, hw_pad - HW)))

    w_t = jnp.transpose(w)                      # (C, c_out): no in-kernel transpose

    grid = (N // tile_n, hw_pad // tile_hw)
    kernel = functools.partial(_se1_kernel, inv_hw=1.0 / float(HW))

    # VMEM budget: double-buffered x tile + resident weight + acc scratch + slack.
    x_tile_bytes = tile_n * C * tile_hw * x_bytes
    acc_bytes = tile_n * C * _LANES * 4
    vmem_limit = min(48 * 1024 * 1024,
                     max(16 * 1024 * 1024,
                         2 * x_tile_bytes + acc_bytes + 2 * 1024 * 1024))

    out = pl.pallas_call(
        kernel,
        out_shape=jax.ShapeDtypeStruct((N, c_out), x.dtype),
        grid_spec=pltpu.PrefetchScalarGridSpec(
            num_scalar_prefetch=0,
            grid=grid,
            in_specs=[
                pl.BlockSpec((tile_n, C, tile_hw), lambda n, hw: (n, 0, hw)),
                pl.BlockSpec((C, c_out), lambda n, hw: (0, 0)),
            ],
            out_specs=pl.BlockSpec((tile_n, c_out), lambda n, hw: (n, 0)),
            scratch_shapes=[pltpu.VMEM((tile_n, C, _LANES), jnp.float32)],
        ),
        compiler_params=pltpu.CompilerParams(
            dimension_semantics=("parallel", "arbitrary"),
            vmem_limit_bytes=int(vmem_limit),
        ),
        cost_estimate=pl.CostEstimate(
            flops=int(N * C * hw_pad + 2 * N * C * c_out),
            transcendentals=int(N * c_out),
            bytes_accessed=int(N * C * hw_pad * x_bytes + C * c_out * 4
                               + N * c_out * x_bytes),
        ),
    )(x3, w_t)

    return out.reshape(N, c_out, 1, 1)


if __name__ == "__main__":
    key = jax.random.PRNGKey(0)
    kx, kw = jax.random.split(key)

    N, c_in, c_out, Hs, Ws = 2, 4, 8, 16, 16

    x = jax.random.normal(kx, (N, c_in, Hs, Ws), dtype=jnp.float32)
    # Deterministic 1x1 conv weight (kaiming-uniform-like scale), shape (c_out, c_in)
    bound = 1.0 / (c_in ** 0.5)
    w = jax.random.uniform(kw, (c_out, c_in), dtype=jnp.float32,
                           minval=-bound, maxval=bound)

    y = se1_forward(x, w)
    jax.block_until_ready(y)

    # Reference check in plain JAX (global avg pool -> 1x1 conv -> sigmoid)
    pooled_ref = jnp.mean(x, axis=(2, 3))                       # (N, c_in)
    y_ref = jax.nn.sigmoid(pooled_ref @ w.T).reshape(N, c_out, 1, 1)
    assert y.shape == (N, c_out, 1, 1)
    assert jnp.allclose(y, y_ref, atol=1e-5, rtol=1e-5)

    print("KERNEL_OK")
</pallas_src>

<mosaic_0001>
module attributes {stable_mosaic.version = 11 : i64} {
  func.func @_se1_kernel(%arg0: i32, %arg1: i32, %arg2: memref<2x4x256xf32, #tpu.memory_space<vmem>>, %arg3: memref<4x8xf32, #tpu.memory_space<vmem>>, %arg4: memref<2x8xf32, #tpu.memory_space<vmem>>, %arg5: memref<2x4x128xf32, #tpu.memory_space<vmem>>) attributes {dimension_semantics = [#tpu.dimension_semantics<parallel>, #tpu.dimension_semantics<arbitrary>], iteration_bounds = array<i64: 1, 1>, scalar_prefetch = 0 : i64, scratch_operands = 1 : i64, tpu.core_type = #tpu.core_type<tc>, window_params = [{transform_indices = @transform_0, window_bounds = array<i64: 2, 4, 256>}, {pipeline_mode = #tpu.pipeline_mode<synchronous>, transform_indices = @transform_1, window_bounds = array<i64: 4, 8>}, {transform_indices = @transform_2, window_bounds = array<i64: 2, 8>}]} {
    %c0_i32 = arith.constant 0 : i32
    %0 = arith.cmpi eq, %arg1, %c0_i32 : i32
    %1 = arith.extui %0 : i1 to i32
    %c0_i32_0 = arith.constant 0 : i32
    %2 = arith.cmpi ne, %1, %c0_i32_0 : i32
    scf.if %2 {
      %cst = arith.constant 0.000000e+00 : f32
      %13 = vector.broadcast %cst : f32 to vector<2x4x128xf32>
      %c0_11 = arith.constant 0 : index
      %c0_12 = arith.constant 0 : index
      %c0_13 = arith.constant 0 : index
      %14 = vector.load %arg5[%c0_11, %c0_12, %c0_13] : memref<2x4x128xf32, #tpu.memory_space<vmem>>, vector<2x4x128xf32>
      tpu.vector_store %arg5[%c0_11, %c0_12, %c0_13], %13 {strides = array<i32>} : memref<2x4x128xf32, #tpu.memory_space<vmem>>, vector<2x4x128xf32>,
    } else {
    }
    %c0 = arith.constant 0 : index
    %c0_1 = arith.constant 0 : index
    %c0_2 = arith.constant 0 : index
    %3 = vector.load %arg2[%c0, %c0_1, %c0_2] : memref<2x4x256xf32, #tpu.memory_space<vmem>>, vector<2x4x256xf32>
    %c0_3 = arith.constant 0 : index
    %c0_4 = arith.constant 0 : index
    %c0_5 = arith.constant 0 : index
    %4 = vector.load %arg5[%c0_3, %c0_4, %c0_5] : memref<2x4x128xf32, #tpu.memory_space<vmem>>, vector<2x4x128xf32>
    %5 = vector.extract_strided_slice %3 {offsets = [0, 0, 0], sizes = [2, 4, 128], strides = [1, 1, 1]} : vector<2x4x256xf32> to vector<2x4x128xf32>
    %6 = arith.addf %4, %5 : vector<2x4x128xf32>
    %7 = vector.extract_strided_slice %3 {offsets = [0, 0, 128], sizes = [2, 4, 128], strides = [1, 1, 1]} : vector<2x4x256xf32> to vector<2x4x128xf32>
    %8 = arith.addf %6, %7 : vector<2x4x128xf32>
    %c0_6 = arith.constant 0 : index
    %c0_7 = arith.constant 0 : index
    %c0_8 = arith.constant 0 : index
    %9 = vector.load %arg5[%c0_6, %c0_7, %c0_8] : memref<2x4x128xf32, #tpu.memory_space<vmem>>, vector<2x4x128xf32>
    tpu.vector_store %arg5[%c0_6, %c0_7, %c0_8], %8 {strides = array<i32>} : memref<2x4x128xf32, #tpu.memory_space<vmem>>, vector<2x4x128xf32>,
    %c0_i32_9 = arith.constant 0 : i32
    %10 = arith.cmpi eq, %arg1, %c0_i32_9 : i32
    %11 = arith.extui %10 : i1 to i32
    %c0_i32_10 = arith.constant 0 : i32
    %12 = arith.cmpi ne, %11, %c0_i32_10 : i32
    scf.if %12 {
      %c0_11 = arith.constant 0 : index
      %c0_12 = arith.constant 0 : index
      %c0_13 = arith.constant 0 : index
      %13 = vector.load %arg5[%c0_11, %c0_12, %c0_13] : memref<2x4x128xf32, #tpu.memory_space<vmem>>, vector<2x4x128xf32>
      %cst = arith.constant dense<0.000000e+00> : vector<2x4xf32>
      %14 = vector.multi_reduction <add>, %13, %cst [2] : vector<2x4x128xf32> to vector<2x4xf32>
      %cst_14 = arith.constant 3.906250e-03 : f32
      %15 = vector.broadcast %cst_14 : f32 to vector<2x4xf32>
      %16 = arith.mulf %14, %15 : vector<2x4xf32>
      %c0_15 = arith.constant 0 : index
      %c0_16 = arith.constant 0 : index
      %17 = vector.load %arg3[%c0_15, %c0_16] : memref<4x8xf32, #tpu.memory_space<vmem>>, vector<4x8xf32>
      %cst_17 = arith.constant dense<0.000000e+00> : vector<2x8xf32>
      %18 = tpu.matmul %16, %17, %cst_17 {dimension_numbers = #tpu.dot_dimension_numbers<[1], [0], [0], [1], [0, 0, 1, 1], [], []>} : vector<2x4xf32>, vector<4x8xf32>, vector<2x8xf32> -> vector<2x8xf32>
      %cst_18 = arith.constant 0.000000e+00 : f32
      %19 = vector.broadcast %cst_18 : f32 to vector<2x8xf32>
      %20 = arith.subf %19, %18 : vector<2x8xf32>
      %21 = math.exp %20 : vector<2x8xf32>
      %cst_19 = arith.constant 1.000000e+00 : f32
      %22 = vector.broadcast %cst_19 : f32 to vector<2x8xf32>
      %23 = arith.addf %22, %21 : vector<2x8xf32>
      %cst_20 = arith.constant 1.000000e+00 : f32
      %24 = vector.broadcast %cst_20 : f32 to vector<2x8xf32>
      %25 = arith.divf %24, %23 : vector<2x8xf32>
      %c0_21 = arith.constant 0 : index
      %c0_22 = arith.constant 0 : index
      %26 = vector.load %arg4[%c0_21, %c0_22] : memref<2x8xf32, #tpu.memory_space<vmem>>, vector<2x8xf32>
      tpu.vector_store %arg4[%c0_21, %c0_22], %25 {strides = array<i32>} : memref<2x8xf32, #tpu.memory_space<vmem>>, vector<2x8xf32>,
    } else {
    }
    return
  }
  func.func @transform_0(%arg0: i32, %arg1: i32) -> (i32, i32, i32) {
    %c0_i32 = arith.constant 0 : i32
    %c0_i32_0 = arith.constant 0 : i32
    return %arg0, %c0_i32, %arg1 : i32, i32, i32
  }
  func.func @transform_1(%arg0: i32, %arg1: i32) -> (i32, i32) {
    %c0_i32 = arith.constant 0 : i32
    %c0_i32_0 = arith.constant 0 : i32
    %c0_i32_1 = arith.constant 0 : i32
    return %c0_i32, %c0_i32_0 : i32, i32
  }
  func.func @transform_2(%arg0: i32, %arg1: i32) -> (i32, i32) {
    %c0_i32 = arith.constant 0 : i32
    %c0_i32_0 = arith.constant 0 : i32
    return %arg0, %c0_i32 : i32, i32
  }
}

</mosaic_0001>

<bundles_post_ra>
// kernel: tpu_custom_call.1
= control target key start
LH: loop header
LB: loop body
LE: loop exit
PB: predicated region body
PF: predicated region fallthrough
CT: control target
= control target key end

     0   :  { %7 = vsyncpa [#allocation4], 0  ;;  %s308_s0 = inlined_call_operand.hbm [shape: f32[2,4,256], index: 0, kind: input, shape index: {}]   ;;  %s309_s1 = inlined_call_operand.hbm [shape: f32[4,8], index: 1, kind: input, shape index: {}]   ;;  %s310_s2 = inlined_call_operand.hbm [shape: f32[2,8], index: 2, kind: output, shape index: {}]  }
   0x1   :  { %8 = vsyncpa [#allocation7], 0 }
   0x2   :  { %9 = vsyncpa [#allocation5], 0  ;;  %s277_s9 = smov [#allocation3]  }
   0x3   :  { %s15_s10 = sshll.u32 %s277_s9, 4  ;;  %s16_s10 = int_to_ptr.vmem [resolvable:$true] %s15_s10 }
   0x4   :  { %s219_s11 = scalar_lea.vmem %s16_s10, 256  ;;  %p224_p1 = scmp.lt.s32.totalorder %s16_s10, %s16_s10 }
   0x5   :  { %p220_p0 = scmp.ne.s32.totalorder %s16_s10, %s219_s11  ;;  %p225_p2 = scmp.lt.s32.totalorder %s219_s11, %s219_s11 }
   0x7   :  { %p226_p3 = por %p225_p2, %p224_p1 }
   0x9   :  { %p227_p4 = pnand %p226_p3, %p220_p0 }
   0xb   :  { %230 = shalt.err (!%p227_p4)
}
   0xc   :  { %s278_s12 = smov 128   ;;  %s279_s13 = smov 8  }
   0xd   :  { %21 = dma.hbm_to_vmem [thread:$0]  %s308_s0, 256, %s16_s10, [#allocation4], %s278_s12, %s278_s12, %s279_s13  }
   0xe   :  { %s280_s16 = smov [#allocation6]  }
   0xf   :  { %s28_s17 = sshll.u32 %s280_s16, 4  ;;  %s29_s17 = int_to_ptr.vmem [resolvable:$true] %s28_s17 }
  0x10   :  { %s239_s18 = scalar_lea.vmem %s29_s17, 64  ;;  %p244_p6 = scmp.lt.s32.totalorder %s29_s17, %s29_s17 }
  0x11   :  { %p240_p5 = scmp.ne.s32.totalorder %s29_s17, %s239_s18  ;;  %p245_p7 = scmp.lt.s32.totalorder %s239_s18, %s239_s18 }
  0x13   :  { %p246_p8 = por %p245_p7, %p244_p6 }
  0x15   :  { %p247_p9 = pnand %p246_p8, %p240_p5 }
  0x17   :  { %250 = shalt.err (!%p247_p9)
}
  0x18   :  { %31 = dma.hbm_to_vmem [thread:$0]  %s309_s1, 64, %s29_s17, [#allocation7]  }
  0x19   :  { %271 = dma.done.wait [#allocation4], 256  }
  0x1a   :  { %272 = vsyncadd [#allocation4], 4294967040 }
  0x1b   :  { %273 = dma.done.wait [#allocation7], 64  }
  0x1c   :  { %274 = vsyncadd [#allocation7], 4294967232  ;;  %v281_v0 = vmov 0.0   ;;  %v44_v1 = vld [vmem:[#allocation3] sm:$0xff]  ;;  %v45_v2 = vld [vmem:[#allocation3 + $0x8] sm:$0xff]  ;;  %vm65_vm0 = vcmask 1043456   ;;  %v77_v16 = vlaneseq }
  0x1d   :  { %42 = vst [vmem:[#allocation2] sm:$0xf] %v281_v0  ;;  %43 = vst [vmem:[#allocation2 + $0x4] sm:$0xf] %v281_v0  ;;  %193 = vmatprep.subr.mxu0 %v281_v0  ;;  %v52_v4 = vcombine.high %v44_v1, %v44_v1  ;;  %v53_v6 = vcombine.high %v45_v2, %v45_v2  ;;  %v74_v15 = vld [vmem:[#allocation6] sm:$0xf] }
  0x1e   :  { %194 = vmatpush3.msk.msra.mxu0 %vm65_vm0, %v74_v15  ;;  %vm282_vm1 = vmmov 0   ;;  %v78_v17 = vand.u32 127, %v77_v16  ;;  %v80_v18 = vshrl.u32 %v77_v16, 7  ;;  %vm87_vm2 = vcmask 1041409   ;;  %s283_s0 = smov [#allocation8]  }
  0x1f   :  { %195 = vmatprep.mubr.msk.f32.mxu0 %vm282_vm1, %v281_v0  ;;  %vm89_vm3 = vcmask 31744   ;;  %s179_s1 = sshll.u32 %s283_s0, 4  ;;  %vm171_vm4 = vcmask 58368   ;;  %s180_s1 = int_to_ptr.vmem [resolvable:$true] %s179_s1 }
  0x20   :  { %v81_v20 = vsub.s32 %v78_v17, %v80_v18  ;;  %s251_s21 = scalar_lea.vmem %s180_s1, 32  ;;  %p256_p11 = scmp.lt.s32.totalorder %s180_s1, %s180_s1 }
  0x21   :  { %p252_p10 = scmp.ne.s32.totalorder %s180_s1, %s251_s21  ;;  %p257_p12 = scmp.lt.s32.totalorder %s251_s21, %s251_s21 }
  0x23   :  { %p258_p13 = por %p257_p12, %p256_p11 }
  0x24   :  { %v46_v3 = vld [vmem:[#allocation2] sm:$0xf]  ;;  %v47_v5 = vld [vmem:[#allocation2 + $0x4] sm:$0xf] }
  0x25   :  { %v48_v7 = vadd.f32 %v46_v3, %v44_v1  ;;  %v49_v8 = vadd.f32 %v47_v5, %v45_v2  ;;  %p259_p0 = pnand %p258_p13, %p252_p10 }
  0x27   :  { %v56_v9 = vadd.f32 %v52_v4, %v48_v7  ;;  %v57_v10 = vadd.f32 %v53_v6, %v49_v8 }
  0x29   :  { %58 = vst [vmem:[#allocation2] sm:$0xf] %v56_v9  ;;  %59 = vst [vmem:[#allocation2 + $0x4] sm:$0xf] %v57_v10 }
  0x30   :  { %v63_v11 = vld [vmem:[#allocation2] sm:$0xf]  ;;  %v64_v12 = vld [vmem:[#allocation2 + $0x4] sm:$0xf] }
  0x31   :  { %v66_v13 = vsel %vm65_vm0, %v63_v11, 0.0  ;;  %v69_v14 = vsel %vm65_vm0, %v64_v12, 0.0 }
  0x32   :  { %67 = vadd.xlane.f32.xlu0 %v66_v13 }
  0x36   :  { %70 = vadd.xlane.f32.xlu0 %v69_v14 }
  0xbb   :  { %v68_v19 = vpop.xlane.xlu0 %67 }
  0xbc   :  { %v72_v21 = vmul.f32 0.00390625, %v68_v19 }
  0xbe   :  { %v82_v24 = vrot.slane %v72_v21, %v81_v20 }
  0xbf   :  { %v71_v22 = vpop.xlane.xlu0 %70 }
  0xc0   :  { %v73_v23 = vmul.f32 0.00390625, %v71_v22 }
  0xc2   :  { %v86_v25 = vrot.slane %v73_v23, %v81_v20 }
  0xc4   :  { %v88_v26 = vsel %vm87_vm2, %v86_v25, %v82_v24 }
  0xc5   :  { %196 = vmatmul.mubr.msk.f32.vlgmr.msra.gmra.mxu0 %vm89_vm3, %v88_v26 }
 0x185   :  { %v161_v27 = vpop.f32.mrf.mxu0 }
 0x186   :  { %v165_v28 = vsub.f32 0.0, %v161_v27 }
 0x187   :  { %v197_v29 = vpop.f32.mrf.mxu0 }
 0x188   :  { %v166_v30 = vmul.f32 1.442695, %v165_v28 }
 0x18a   :  { %207 = vpow2.f32 %v166_v30 }
 0x197   :  { %v208_v31 = vpop.eup %207 }
 0x198   :  { %v168_v32 = vadd.f32 1.0, %v208_v31 }
 0x19a   :  { %209 = vrcp.f32 %v168_v32 }
 0x1a7   :  { %v210_v33 = vpop.eup %209 }
 0x1a8   :  { %172 = vst.msk [vmem:[#allocation8] sm:$0x3] %vm171_vm4, %v210_v33 }
 0x1a9   :  { %262 = shalt.err (!%p259_p0)
}
 0x1aa   :  { %182 = dma.vmem_to_hbm [thread:$0]  %s180_s1, 32, %s310_s2, [#allocation5]  }
 0x1ab   :  { %275 = dma.done.wait [#allocation5], 32  }
 0x1ac   :  { %276 = vsyncadd [#allocation5], 4294967264 }
 0x1ad   :  { %186 = vsyncpa [#allocation4], 1 }
 0x1ae   :  { %187 = vsyncpa [#allocation7], 1 }
 0x1af   :  { %188 = vsyncpa [#allocation5], 1 }

</bundles_post_ra>
